<compile_context>
chip_gen: v5e
topology: v5e:2x2
jax: 0.10.0
libtpu: 0.0.40
codegen_flags: <defaults>
</compile_context>

<pallas_src>
import functools

import jax
import jax.numpy as jnp
from jax import lax
from jax.experimental import pallas as pl
from jax.experimental.pallas import tpu as pltpu


def _focal_loss_kernel(x_ref, t_ref, o_ref, *, gamma, alpha, hw, cps, need_mask):
    """x_ref (1,C,TS,128) logits, t_ref (1,1,TS,128) targets, o_ref (1,1,1,128) acc."""
    p = pl.program_id(1)          # chunk-axis split (megacore work for small N)
    k = pl.program_id(2)          # chunk index within the split

    @pl.when(k == 0)
    def _():
        o_ref[...] = jnp.zeros_like(o_ref)

    _, c, ts, l = x_ref.shape
    t0 = t_ref[0, 0]              # (TS, 128) int32 class ids

    # Gather the target-class logit in the input's NATIVE dtype (exact: one-hot
    # select), fusing the per-class alpha gather onto the same compare.
    fuse_alpha = (alpha is not None) and (len(alpha) == c)
    x_t = jnp.zeros((ts, l), dtype=x_ref.dtype)
    at = jnp.zeros((ts, l), jnp.float32) if alpha is not None else None
    for kcls in range(c):
        sel = t0 == kcls
        x_t = jnp.where(sel, x_ref[0, kcls], x_t)
        if fuse_alpha:
            at = jnp.where(sel, jnp.float32(alpha[kcls]), at)
    x_t = x_t.astype(jnp.float32)                       # cast per pixel, not per class
    if alpha is not None and not fuse_alpha:
        # len(alpha) != C (e.g. scalar alpha with C > 2): gather by class id.
        # NOTE: classes >= len(alpha) silently get at = 0 (PyTorch would raise).
        for kcls in range(len(alpha)):
            at = jnp.where(t0 == kcls, jnp.float32(alpha[kcls]), at)

    def accumulate(valid):
        # Keep padded lanes finite BEFORE the transcendentals, mask loss AFTER.
        xt = x_t if valid is None else jnp.where(valid, x_t, 0.0)
        # log(sigmoid(x)) = min(x,0) - log1p(exp(-|x|)); pt = sigmoid(x) reuses e.
        e = jnp.exp(-jnp.abs(xt))
        logpt = jnp.minimum(xt, 0.0) - jnp.log1p(e)
        pt = jnp.where(xt >= 0.0, 1.0, e) / (1.0 + e)
        lp = logpt if at is None else logpt * at
        one_minus_pt = 1.0 - pt
        if float(gamma).is_integer() and float(gamma) >= 0:
            w = lax.integer_pow(one_minus_pt, int(gamma))      # pure VPU multiplies
        else:
            w = jnp.power(one_minus_pt, jnp.float32(gamma))    # exp/log fallback
        loss = -w * lp
        if valid is not None:
            loss = jnp.where(valid, loss, 0.0)
        # Fold this chunk into the tiny resident accumulator (one XLU reduce).
        o_ref[...] += jnp.sum(loss, axis=0, keepdims=True)[None, None]

    if need_mask:
        # Only the very last chunk can contain padded pixels / padded rows.
        row = lax.broadcasted_iota(jnp.int32, (ts, l), 0)
        lane = lax.broadcasted_iota(jnp.int32, (ts, l), 1)
        pix = ((p * cps + k) * ts + row) * l + lane
        is_tail = jnp.logical_and(p == pl.num_programs(1) - 1,
                                  k == pl.num_programs(2) - 1)

        @pl.when(is_tail)
        def _():
            accumulate(pix < hw)

        @pl.when(jnp.logical_not(is_tail))
        def _():
            accumulate(None)
    else:
        accumulate(None)


def focal_loss(x_nchw, target_nhw, *, gamma=2, alpha=None, size_average=True,
               tile_s=None, vmem_budget_bytes=28 * 1024 * 1024):
    """Pallas FocalLoss forward. x_nchw: (N, C, H, W) float, target: (N, H, W) int."""
    n, c, h, w = x_nchw.shape
    hw = h * w
    itemsize = jnp.dtype(x_nchw.dtype).itemsize

    # Lane-dense 2-D pixel view (N, C, S, 128).  Reshape is free when
    # H*W % 128 == 0; otherwise pad the tail lanes (masked inside the kernel).
    hw_pad = ((hw + 127) // 128) * 128
    x3 = x_nchw.reshape(n, c, hw)
    t3 = target_nhw.reshape(n, 1, hw).astype(jnp.int32)
    if hw_pad != hw:
        x3 = jnp.pad(x3, ((0, 0), (0, 0), (0, hw_pad - hw)))
        t3 = jnp.pad(t3, ((0, 0), (0, 0), (0, hw_pad - hw)))
    s = hw_pad // 128
    x4 = x3.reshape(n, c, s, 128)
    t4 = t3.reshape(n, 1, s, 128)

    # Rows (sublane dim) per block, sized so the per-step VMEM footprint
    # (double-buffered inputs + elementwise temporaries) stays within budget.
    if tile_s is None:
        per_pixel_bytes = 2 * (c * itemsize + 4) + 4 * c + 6 * 4
        tile_s = vmem_budget_bytes // (per_pixel_bytes * 128)
    tile_s = max(1, int(tile_s))
    if tile_s >= s:
        tile_s = s                               # full dim: no (8,128) constraint
    else:
        tile_s = max(8, (tile_s // 8) * 8)       # else multiple of 8 sublanes
        if tile_s >= s:
            tile_s = s
    n_chunks = pl.cdiv(s, tile_s)
    need_mask = (n_chunks * tile_s * 128) != hw  # any lane/row padding anywhere?

    # Split the chunk axis so both v7x TensorCores have work even when N is
    # small; each (row, split) keeps its own resident accumulator block.
    n_split = 2 if (n_chunks % 2 == 0 and n_chunks >= 2) else 1
    cps = n_chunks // n_split

    # alpha exactly as the PyTorch __init__: scalar -> [a, 1-a]; list -> tensor.
    if alpha is None:
        alpha_t = None
    elif isinstance(alpha, (float, int)):
        alpha_t = (float(alpha), 1.0 - float(alpha))
    else:
        alpha_t = tuple(float(a) for a in alpha)

    kernel = functools.partial(_focal_loss_kernel, gamma=gamma, alpha=alpha_t,
                               hw=hw, cps=cps, need_mask=need_mask)

    # Explicit scoped-VMEM limit: 2x double-buffered inputs + room for the
    # in-kernel f32 temporaries + headroom (v5e default is only 16 MiB; keep
    # well under v7x's 64 MiB physical VMEM).
    x_block = c * tile_s * 128 * itemsize
    t_block = tile_s * 128 * 4
    pix_block = tile_s * 128 * 4
    vmem_limit = 2 * (x_block + t_block) + c * pix_block + 6 * pix_block + (2 << 20)
    vmem_limit = int(min(max(vmem_limit, 8 << 20), 48 << 20))

    partial = pl.pallas_call(
        kernel,
        out_shape=jax.ShapeDtypeStruct((n, n_split, 1, 128), jnp.float32),
        grid_spec=pltpu.PrefetchScalarGridSpec(
            num_scalar_prefetch=0,
            grid=(n, n_split, cps),
            in_specs=[
                pl.BlockSpec((1, c, tile_s, 128),
                             lambda i, p, k: (i, 0, p * cps + k, 0)),   # logits
                pl.BlockSpec((1, 1, tile_s, 128),
                             lambda i, p, k: (i, 0, p * cps + k, 0)),   # targets
            ],
            out_specs=pl.BlockSpec((1, 1, 1, 128),
                                   lambda i, p, k: (i, p, 0, 0)),
        ),
        compiler_params=pltpu.CompilerParams(
            dimension_semantics=("parallel", "parallel", "arbitrary"),
            vmem_limit_bytes=vmem_limit),
    )(x4, t4)

    total = jnp.sum(partial)                     # tiny (N * n_split * 128) reduce
    if size_average:
        return total / jnp.float32(n * hw)
    return total


def focal_loss_ref(x_nchw, target_nhw, *, gamma=2, alpha=None, size_average=True):
    """Pure-JAX reference mirroring the PyTorch forward exactly."""
    n, c, h, w = x_nchw.shape
    x2d = jnp.transpose(x_nchw.reshape(n, c, h * w), (0, 2, 1)).reshape(-1, c)
    t = target_nhw.reshape(-1).astype(jnp.int32)
    logpt_full = jax.nn.log_sigmoid(x2d.astype(jnp.float32))
    logpt = jnp.take_along_axis(logpt_full, t[:, None], axis=1)[:, 0]
    pt = jnp.exp(logpt)
    if alpha is not None:
        if isinstance(alpha, (float, int)):
            alpha = jnp.array([alpha, 1.0 - alpha], jnp.float32)
        else:
            alpha = jnp.asarray(alpha, jnp.float32)
        logpt = logpt * alpha[t]
    loss = -((1.0 - pt) ** gamma) * logpt
    return jnp.mean(loss) if size_average else jnp.sum(loss)


if __name__ == "__main__":
    key = jax.random.PRNGKey(0)

    cases = [
        # main case: N=2,C=4,16x16, per-class alpha, gamma=2 (single chunk)
        dict(n=2, c=4, h=16, w=16, gamma=2, alpha=[0.25, 0.25, 0.25, 0.25],
             size_average=True, tile_s=None, dtype=jnp.float32),
        # module defaults: gamma=0, no alpha
        dict(n=2, c=4, h=16, w=16, gamma=0, alpha=None,
             size_average=True, tile_s=None, dtype=jnp.float32),
        # scalar alpha (binary), non-integer gamma, sum reduction
        dict(n=2, c=2, h=16, w=16, gamma=1.5, alpha=0.25,
             size_average=False, tile_s=None, dtype=jnp.float32),
        # H*W=320 not a multiple of 128 -> lane padding + tail masking
        dict(n=1, c=4, h=16, w=20, gamma=2, alpha=None,
             size_average=True, tile_s=None, dtype=jnp.float32),
        # multi-chunk accumulation + even chunk-axis split (S=32, TILE_S=8)
        dict(n=1, c=4, h=64, w=64, gamma=2, alpha=[0.25, 0.25, 0.25, 0.25],
             size_average=True, tile_s=8, dtype=jnp.float32),
        # multi-chunk odd chunk count (no split) + bf16 logits
        dict(n=2, c=4, h=48, w=64, gamma=2, alpha=None,
             size_average=True, tile_s=8, dtype=jnp.bfloat16),
    ]

    for idx, cfg in enumerate(cases):
        kx, kt = jax.random.split(jax.random.fold_in(key, idx))
        x = jax.random.normal(kx, (cfg["n"], cfg["c"], cfg["h"], cfg["w"]),
                              jnp.float32).astype(cfg["dtype"])
        tgt = jax.random.randint(kt, (cfg["n"], cfg["h"], cfg["w"]),
                                 0, cfg["c"], jnp.int32)

        out = focal_loss(x, tgt, gamma=cfg["gamma"], alpha=cfg["alpha"],
                         size_average=cfg["size_average"], tile_s=cfg["tile_s"])
        out = jax.block_until_ready(out)

        ref = focal_loss_ref(x, tgt, gamma=cfg["gamma"], alpha=cfg["alpha"],
                             size_average=cfg["size_average"])
        assert jnp.allclose(out, ref, rtol=2e-5, atol=1e-6), (idx, out, ref)

    print("KERNEL_OK")
</pallas_src>

<mosaic_0001>
module attributes {stable_mosaic.version = 11 : i64} {
  func.func @_focal_loss_kernel(%arg0: i32, %arg1: i32, %arg2: i32, %arg3: memref<1x4x2x128xf32, #tpu.memory_space<vmem>>, %arg4: memref<1x1x2x128xi32, #tpu.memory_space<vmem>>, %arg5: memref<1x1x1x128xf32, #tpu.memory_space<vmem>>) attributes {dimension_semantics = [#tpu.dimension_semantics<parallel>, #tpu.dimension_semantics<parallel>, #tpu.dimension_semantics<arbitrary>], iteration_bounds = array<i64: 2, 1, 1>, scalar_prefetch = 0 : i64, scratch_operands = 0 : i64, tpu.core_type = #tpu.core_type<tc>, window_params = [{transform_indices = @transform_0, window_bounds = array<i64: 1, 4, 2, 128>}, {transform_indices = @transform_1, window_bounds = array<i64: 1, 1, 2, 128>}, {transform_indices = @transform_2, window_bounds = array<i64: 1, 1, 1, 128>}]} {
    %c0_i32 = arith.constant 0 : i32
    %0 = arith.cmpi eq, %arg2, %c0_i32 : i32
    %1 = arith.extui %0 : i1 to i32
    %c0_i32_0 = arith.constant 0 : i32
    %2 = arith.cmpi ne, %1, %c0_i32_0 : i32
    scf.if %2 {
      %cst_39 = arith.constant 0.000000e+00 : f32
      %63 = vector.broadcast %cst_39 : f32 to vector<1x1x1x128xf32>
      %c0_40 = arith.constant 0 : index
      %c0_41 = arith.constant 0 : index
      %c0_42 = arith.constant 0 : index
      %c0_43 = arith.constant 0 : index
      %64 = vector.load %arg5[%c0_40, %c0_41, %c0_42, %c0_43] : memref<1x1x1x128xf32, #tpu.memory_space<vmem>>, vector<1x1x1x128xf32>
      tpu.vector_store %arg5[%c0_40, %c0_41, %c0_42, %c0_43], %63 {strides = array<i32>} : memref<1x1x1x128xf32, #tpu.memory_space<vmem>>, vector<1x1x1x128xf32>,
    } else {
    }
    %c0 = arith.constant 0 : index
    %c0_1 = arith.constant 0 : index
    %c0_2 = arith.constant 0 : index
    %c0_3 = arith.constant 0 : index
    %3 = vector.load %arg4[%c0, %c0_1, %c0_2, %c0_3] : memref<1x1x2x128xi32, #tpu.memory_space<vmem>>, vector<1x1x2x128xi32>
    %4 = vector.shape_cast %3 : vector<1x1x2x128xi32> to vector<2x128xi32>
    %cst = arith.constant 0.000000e+00 : f32
    %5 = vector.broadcast %cst : f32 to vector<2x128xf32>
    %cst_4 = arith.constant 0.000000e+00 : f32
    %6 = vector.broadcast %cst_4 : f32 to vector<2x128xf32>
    %c0_i32_5 = arith.constant 0 : i32
    %7 = vector.broadcast %c0_i32_5 : i32 to vector<2x128xi32>
    %8 = arith.cmpi eq, %4, %7 : vector<2x128xi32>
    %c0_6 = arith.constant 0 : index
    %c0_7 = arith.constant 0 : index
    %c0_8 = arith.constant 0 : index
    %c0_9 = arith.constant 0 : index
    %9 = vector.load %arg3[%c0_6, %c0_7, %c0_8, %c0_9] : memref<1x4x2x128xf32, #tpu.memory_space<vmem>>, vector<1x1x2x128xf32>
    %10 = vector.shape_cast %9 : vector<1x1x2x128xf32> to vector<2x128xf32>
    %11 = arith.select %8, %10, %5 : vector<2x128xi1>, vector<2x128xf32>
    %cst_10 = arith.constant 2.500000e-01 : f32
    %12 = vector.broadcast %cst_10 : f32 to vector<2x128xf32>
    %13 = arith.select %8, %12, %6 : vector<2x128xi1>, vector<2x128xf32>
    %c1_i32 = arith.constant 1 : i32
    %14 = vector.broadcast %c1_i32 : i32 to vector<2x128xi32>
    %15 = arith.cmpi eq, %4, %14 : vector<2x128xi32>
    %c0_11 = arith.constant 0 : index
    %c1 = arith.constant 1 : index
    %c0_12 = arith.constant 0 : index
    %c0_13 = arith.constant 0 : index
    %16 = vector.load %arg3[%c0_11, %c1, %c0_12, %c0_13] : memref<1x4x2x128xf32, #tpu.memory_space<vmem>>, vector<1x1x2x128xf32>
    %17 = vector.shape_cast %16 : vector<1x1x2x128xf32> to vector<2x128xf32>
    %18 = arith.select %15, %17, %11 : vector<2x128xi1>, vector<2x128xf32>
    %cst_14 = arith.constant 2.500000e-01 : f32
    %19 = vector.broadcast %cst_14 : f32 to vector<2x128xf32>
    %20 = arith.select %15, %19, %13 : vector<2x128xi1>, vector<2x128xf32>
    %c2_i32 = arith.constant 2 : i32
    %21 = vector.broadcast %c2_i32 : i32 to vector<2x128xi32>
    %22 = arith.cmpi eq, %4, %21 : vector<2x128xi32>
    %c0_15 = arith.constant 0 : index
    %c2 = arith.constant 2 : index
    %c0_16 = arith.constant 0 : index
    %c0_17 = arith.constant 0 : index
    %23 = vector.load %arg3[%c0_15, %c2, %c0_16, %c0_17] : memref<1x4x2x128xf32, #tpu.memory_space<vmem>>, vector<1x1x2x128xf32>
    %24 = vector.shape_cast %23 : vector<1x1x2x128xf32> to vector<2x128xf32>
    %25 = arith.select %22, %24, %18 : vector<2x128xi1>, vector<2x128xf32>
    %cst_18 = arith.constant 2.500000e-01 : f32
    %26 = vector.broadcast %cst_18 : f32 to vector<2x128xf32>
    %27 = arith.select %22, %26, %20 : vector<2x128xi1>, vector<2x128xf32>
    %c3_i32 = arith.constant 3 : i32
    %28 = vector.broadcast %c3_i32 : i32 to vector<2x128xi32>
    %29 = arith.cmpi eq, %4, %28 : vector<2x128xi32>
    %c0_19 = arith.constant 0 : index
    %c3 = arith.constant 3 : index
    %c0_20 = arith.constant 0 : index
    %c0_21 = arith.constant 0 : index
    %30 = vector.load %arg3[%c0_19, %c3, %c0_20, %c0_21] : memref<1x4x2x128xf32, #tpu.memory_space<vmem>>, vector<1x1x2x128xf32>
    %31 = vector.shape_cast %30 : vector<1x1x2x128xf32> to vector<2x128xf32>
    %32 = arith.select %29, %31, %25 : vector<2x128xi1>, vector<2x128xf32>
    %cst_22 = arith.constant 2.500000e-01 : f32
    %33 = vector.broadcast %cst_22 : f32 to vector<2x128xf32>
    %34 = arith.select %29, %33, %27 : vector<2x128xi1>, vector<2x128xf32>
    %35 = math.absf %32 : vector<2x128xf32>
    %cst_23 = arith.constant 0.000000e+00 : f32
    %36 = vector.broadcast %cst_23 : f32 to vector<2x128xf32>
    %37 = arith.subf %36, %35 : vector<2x128xf32>
    %38 = math.exp %37 : vector<2x128xf32>
    %cst_24 = arith.constant 0.000000e+00 : f32
    %39 = vector.broadcast %cst_24 : f32 to vector<2x128xf32>
    %40 = arith.minimumf %32, %39 : vector<2x128xf32>
    %41 = math.log1p %38 : vector<2x128xf32>
    %42 = arith.subf %40, %41 : vector<2x128xf32>
    %cst_25 = arith.constant 0.000000e+00 : f32
    %43 = vector.broadcast %cst_25 : f32 to vector<2x128xf32>
    %44 = arith.cmpf oge, %32, %43 : vector<2x128xf32>
    %cst_26 = arith.constant 1.000000e+00 : f32
    %45 = vector.broadcast %cst_26 : f32 to vector<2x128xf32>
    %46 = arith.select %44, %45, %38 : vector<2x128xi1>, vector<2x128xf32>
    %cst_27 = arith.constant 1.000000e+00 : f32
    %47 = vector.broadcast %cst_27 : f32 to vector<2x128xf32>
    %48 = arith.addf %47, %38 : vector<2x128xf32>
    %49 = arith.divf %46, %48 : vector<2x128xf32>
    %50 = arith.mulf %42, %34 : vector<2x128xf32>
    %cst_28 = arith.constant 1.000000e+00 : f32
    %51 = vector.broadcast %cst_28 : f32 to vector<2x128xf32>
    %52 = arith.subf %51, %49 : vector<2x128xf32>
    %53 = arith.mulf %52, %52 : vector<2x128xf32>
    %cst_29 = arith.constant 0.000000e+00 : f32
    %54 = vector.broadcast %cst_29 : f32 to vector<2x128xf32>
    %55 = arith.subf %54, %53 : vector<2x128xf32>
    %56 = arith.mulf %55, %50 : vector<2x128xf32>
    %c0_30 = arith.constant 0 : index
    %c0_31 = arith.constant 0 : index
    %c0_32 = arith.constant 0 : index
    %c0_33 = arith.constant 0 : index
    %57 = vector.load %arg5[%c0_30, %c0_31, %c0_32, %c0_33] : memref<1x1x1x128xf32, #tpu.memory_space<vmem>>, vector<1x1x1x128xf32>
    %cst_34 = arith.constant dense<0.000000e+00> : vector<128xf32>
    %58 = vector.multi_reduction <add>, %56, %cst_34 [0] : vector<2x128xf32> to vector<128xf32>
    %59 = vector.shape_cast %58 : vector<128xf32> to vector<1x128xf32>
    %60 = vector.shape_cast %59 : vector<1x128xf32> to vector<1x1x1x128xf32>
    %61 = arith.addf %57, %60 : vector<1x1x1x128xf32>
    %c0_35 = arith.constant 0 : index
    %c0_36 = arith.constant 0 : index
    %c0_37 = arith.constant 0 : index
    %c0_38 = arith.constant 0 : index
    %62 = vector.load %arg5[%c0_35, %c0_36, %c0_37, %c0_38] : memref<1x1x1x128xf32, #tpu.memory_space<vmem>>, vector<1x1x1x128xf32>
    tpu.vector_store %arg5[%c0_35, %c0_36, %c0_37, %c0_38], %61 {strides = array<i32>} : memref<1x1x1x128xf32, #tpu.memory_space<vmem>>, vector<1x1x1x128xf32>,
    return
  }
  func.func @transform_0(%arg0: i32, %arg1: i32, %arg2: i32) -> (i32, i32, i32, i32) {
    %c1_i32 = arith.constant 1 : i32
    %0 = arith.muli %arg1, %c1_i32 : i32
    %1 = arith.addi %0, %arg2 : i32
    %c0_i32 = arith.constant 0 : i32
    %c0_i32_0 = arith.constant 0 : i32
    %c0_i32_1 = arith.constant 0 : i32
    return %arg0, %c0_i32, %1, %c0_i32_0 : i32, i32, i32, i32
  }
  func.func @transform_1(%arg0: i32, %arg1: i32, %arg2: i32) -> (i32, i32, i32, i32) {
    %c1_i32 = arith.constant 1 : i32
    %0 = arith.muli %arg1, %c1_i32 : i32
    %1 = arith.addi %0, %arg2 : i32
    %c0_i32 = arith.constant 0 : i32
    %c0_i32_0 = arith.constant 0 : i32
    %c0_i32_1 = arith.constant 0 : i32
    return %arg0, %c0_i32, %1, %c0_i32_0 : i32, i32, i32, i32
  }
  func.func @transform_2(%arg0: i32, %arg1: i32, %arg2: i32) -> (i32, i32, i32, i32) {
    %c0_i32 = arith.constant 0 : i32
    %c0_i32_0 = arith.constant 0 : i32
    %c0_i32_1 = arith.constant 0 : i32
    return %arg0, %arg1, %c0_i32, %c0_i32_0 : i32, i32, i32, i32
  }
}

</mosaic_0001>

<bundles_post_ra>
// kernel: tpu_custom_call.1
= control target key start
LH: loop header
LB: loop body
LE: loop exit
PB: predicated region body
PF: predicated region fallthrough
CT: control target
= control target key end

     0   :  { %7 = vsyncpa [#allocation3], 0  ;;  %s844_s0 = inlined_call_operand.hbm [shape: f32[2,4,2,128], index: 0, kind: input, shape index: {}]   ;;  %s845_s1 = inlined_call_operand.hbm [shape: s32[2,1,2,128], index: 1, kind: input, shape index: {}]   ;;  %s846_s2 = inlined_call_operand.hbm [shape: f32[2,1,1,128], index: 2, kind: output, shape index: {}]  }
   0x1   :  { %9 = vsyncpa [#allocation3 + $0x1], 0 }
   0x2   :  { %10 = vsyncpa [#allocation6], 0 }
   0x3   :  { %12 = vsyncpa [#allocation6 + $0x1], 0 }
   0x4   :  { %13 = vsyncpa [#allocation4], 0 }
   0x5   :  { %15 = vsyncpa [#allocation4 + $0x1], 0  ;;  %s691_s9 = smov 0   ;;  %s693_s10 = smov 0  }
   0x6   :  { %s695_s11 = smov 0   ;;  %s697_s12 = smov 0  }
   0x7   :  { %s699_s13 = smov 0   ;;  %s701_s14 = smov 0  }
   0x8 LB: > { %s431_s15 = sadd.s32 4294967295, %s671_s14   ;;  %s432_s16 = sadd.s32 4294967294, %s671_s14   ;;  %s671_s14 = sphi %s701_s14, %s21_s14   ;;  %s667_s13 = sphi %s699_s13, %s856_s13   ;;  %s663_s12 = sphi %s697_s12, %s855_s12   ;;  %s659_s11 = sphi %s695_s11, %s854_s11   ;;  %s655_s10 = sphi %s693_s10, %s853_s10   ;;  %s651_s9 = sphi %s691_s9, %s852_s9  }
   0x9   : > { %s40_s17 = sadd.s32 1, %s667_s13  ;;  %s51_s18 = sadd.s32 1, %s659_s11 }
   0xa   : > { %p42_p0 = scmp.ge.s32.totalorder %s40_s17, 2  ;;  %p58_p1 = scmp.ne.s32.totalorder %s659_s11, %s655_s10 }
   0xb   : > { %p59_p2 = scmp.eq.s32.totalorder %s671_s14, 0  ;;  %p64_p3 = scmp.ne.s32.totalorder %s655_s10, %s651_s9 }
   0xc   : > { %s858_s17 = smov (%p42_p0, %s40_s17), 0  ;;  %p65_p5 = scmp.eq.s32.totalorder %s431_s15, 0 }
   0xd   : > { %p732_p4 = por %p59_p2, %p58_p1  ;;  %s46_s20 = ssub.s32 %s667_s13, %s858_s17 }
   0xe   : > { %p120_p6 = scmp.eq.s32.totalorder %s431_s15, 1  ;;  %p49_p7 = scmp.eq.s32.totalorder %s46_s20, 0 }
   0xf   : > { %p738_p8 = por %p65_p5, %p64_p3  ;;  %p126_p10 = scmp.eq.s32.totalorder %s432_s16, 1 }
  0x10   : > { %p742_p9 = por %p120_p6, %p58_p1  ;;  %p434_p12 = scmp.ge.s32.totalorder %s671_s14, 2 }
  0x11   : > { %s747_s23 = scalar_select %p49_p7, %s659_s11, %s51_s18  }
  0x12   : > { %p749_p11 = por %p126_p10, %p64_p3  ;;  %p466_p13 = scmp.lt.s32.totalorder %s671_s14, 2 }
  0x13   : > { %s146_s25 = sand.u32 1, %s659_s11   ;;  %s448_s27 = sshll.u32 %s667_s13, 3 }
  0x14   : > { %s435_s26 = sshll.u32 %s146_s25, 3  ;;  %s157_s30 = scalar_lea.hbm %s844_s0, %s448_s27 }
  0x15   : > { %s150_s3 = scalar_lea.vmem [#allocation2], %s435_s26  ;;  %s158_s5 = sshll.u32 %s157_s30, 4  ;;  %s159_s5 = int_to_ptr.hbm [resolvable:$true] %s158_s5 }
  0x16   : > { %s160_s4 = sshll.u32 %s150_s3, 4  ;;  %p762_p0 = pnand %p466_p13, %p732_p4  ;;  %s161_s4 = int_to_ptr.vmem [resolvable:$true] %s160_s4 }
  0x17   : > { %p440_p1 = scmp.ge.s32.totalorder %s671_s14, 1  ;;  %s147_s7 = scalar_lea.sflag [#allocation3], %s146_s25 }
  0x18   : > { %s673_s8 = smov 32   ;;  %s674_s15 = smov 2  }
  0x19   : > { %458 = dma.hbm_to_vmem [thread:$0]  (!%p762_p0), %s159_s5, 128, %s161_s4, %s147_s7, %s673_s8, %s673_s8, %s674_s15  }
  0x1a   : > { %p189_p2 = scmp.lt.s32.totalorder %s671_s14, 3  ;;  %s438_s16 = sshll.u32 %s146_s25, 1 }
  0x1b   : > { %s439_s18 = sshll.u32 %s667_s13, 1  ;;  %s174_s27 = scalar_lea.vmem [#allocation5], %s438_s16 }
  0x1c   : > { %p190_p3 = pnand %p440_p1, %p189_p2  ;;  %s180_s19 = scalar_lea.hbm %s845_s1, %s439_s18 }
  0x1d   : > { %s184_s28 = sshll.u32 %s174_s27, 4  ;;  %s182_s29 = sshll.u32 %s180_s19, 4  ;;  %s185_s28 = int_to_ptr.vmem [resolvable:$true] %s184_s28  ;;  %s183_s29 = int_to_ptr.hbm [resolvable:$true] %s182_s29 }
  0x1e   : > { %s171_s30 = scalar_lea.sflag [#allocation6], %s146_s25  ;;  %193 = sbr.rel (%p190_p3) target bundleno = 105 (0x69), region = 28 }
  0x1f   : > { %461 = dma.hbm_to_vmem [thread:$0]  (!%p762_p0), %s183_s29, 32, %s185_s28, %s171_s30  }
  0x20   : > { %s777_s3 = sand.u32 (!%p190_p3), 1, %s655_s10  }
  0x21   : > { %s441_s4 = sshll.u32 (!%p190_p3), %s777_s3, 3  ;;  %s196_s5 = scalar_lea.sflag (!%p190_p3), [#allocation3], %s777_s3 }
  0x22   : > { %s199_s7 = scalar_lea.vmem (!%p190_p3), [#allocation2], %s441_s4 }
  0x23   : > { %638 = dma.done.wait (%p738_p8), %s196_s5, 128  }
  0x24   : > { %640 = vsyncadd (%p738_p8), %s196_s5, 4294967168  ;;  %s442_s25 = sshll.u32 %s777_s3, 1  ;;  %s206_s6 = scalar_lea.sflag [#allocation6], %s777_s3 }
  0x25   : > { %s209_s8 = scalar_lea.vmem [#allocation5], %s442_s25 }
  0x26   : > { %642 = dma.done.wait (%p738_p8), %s206_s6, 32  }
  0x27   : > { %644 = vsyncadd (%p738_p8), %s206_s6, 4294967264  ;;  %s792_s15 = scalar_lea.vmem [#allocation7], %s777_s3  ;;  %v675_v0 = vmov 0.0   ;;  %v242_v1 = vld [vmem:[%s209_s8] sm:$0x3]  ;;  %vm301_vm10 = vcmask 1041408   ;;  %s321_s18 = scalar_lea.hbm %s846_s2, %s663_s12 }
  0x28   : > { %241 = vst [vmem:[%s792_s15] sm:$0x1] %v675_v0  ;;  %v244_v2 = vld [vmem:[%s199_s7] sm:$0x3]  ;;  %v443_v3 = vld [vmem:[%s199_s7 + $0x2] sm:$0x3]  ;;  %vm243_vm0 = vcmp.eq.s32.totalorder %v242_v1, 0 }
  0x29   : > { %vm247_vm1 = vcmp.eq.s32.totalorder %v242_v1, 1  ;;  %vm252_vm2 = vcmp.eq.s32.totalorder %v242_v1, 2  ;;  %v444_v4 = vld [vmem:[%s199_s7 + $0x4] sm:$0x3]  ;;  %v245_v5 = vsel %vm243_vm0, %v244_v2, 0.0  ;;  %vm257_vm3 = vcmp.eq.s32.totalorder %v242_v1, 3 }
  0x2a   : > { %v445_v6 = vld [vmem:[%s199_s7 + $0x6] sm:$0x3]  ;;  %v250_v7 = vsel %vm247_vm1, %v443_v3, %v245_v5  ;;  %v246_v21 = vsel %vm243_vm0, 0.25, %v675_v0  ;;  %s323_s20 = sshll.u32 %s792_s15, 4  ;;  %s325_s26 = sshll.u32 %s321_s18, 4  ;;  %s324_s20 = int_to_ptr.vmem [resolvable:$true] %s323_s20  ;;  %s326_s26 = int_to_ptr.hbm [resolvable:$true] %s325_s26 }
  0x2b   : > { %v255_v8 = vsel %vm252_vm2, %v444_v4, %v250_v7  ;;  %v251_v28 = vsel %vm247_vm1, 0.25, %v246_v21  ;;  %s312_s19 = scalar_lea.sflag [#allocation4], %s777_s3  ;;  %s599_s27 = sshra.s32 %s326_s26, 4  ;;  %s600_s27 = int_to_ptr.hbm [resolvable:$true] %s599_s27 }
  0x2c   : > { %v260_v9 = vsel %vm257_vm3, %v445_v6, %v255_v8  ;;  %v256_v34 = vsel %vm252_vm2, 0.25, %v251_v28  ;;  %s601_s28 = scalar_lea.hbm %s600_s27, 1  ;;  %s605_s12 = scalar_lea.hbm %s846_s2, 2 }
  0x2d   : > { %v262_v10 = vand.u32 2147483647, %v260_v9  ;;  %vm277_vm7 = vcmp.ge.f32.partialorder %v260_v9, 0.0  ;;  %v266_v30 = vmin.f32 %v260_v9, 0.0  ;;  %v261_v39 = vsel %vm257_vm3, 0.25, %v256_v34  ;;  %p602_p4 = scmp.ne.s32.totalorder %s600_s27, %s601_s28  ;;  %p606_p7 = scmp.lt.s32.totalorder %s600_s27, %s846_s2 }
  0x2e   : > { %p607_p8 = scmp.lt.s32.totalorder %s605_s12, %s601_s28 }
  0x2f   : > { %v263_v11 = vsub.f32 0.0, %v262_v10  ;;  %v300_v51 = vld [vmem:[%s792_s15] sm:$0x1]  ;;  %p603_p5 = pnand %p602_p4, %p742_p9 }
  0x30   : > { %p608_p10 = por %p607_p8, %p606_p7 }
  0x31   : > { %v264_v12 = vmul.f32 1.442695, %v263_v11  ;;  %p604_p6 = pneg %p603_p5 }
  0x33   : > { %519 = vpow2.f32 %v264_v12  ;;  %p609_p13 = pnand %p608_p10, %p604_p6 }
  0x39   : > { %v520_v13 = vpop.eup %519 }
  0x3a   : > { %v267_v14 = vadd.f32 1.0, %v520_v13  ;;  %v270_v15 = vmul.f32 -0.5, %v520_v13  ;;  %v273_v19 = vand.u32 2147483647, %v520_v13  ;;  %v278_v33 = vsel %vm277_vm7, 1.0, %v520_v13 }
  0x3c   : > { %521 = vrcp.f32 %v267_v14  ;;  %v271_v17 = vadd.f32 1.0, %v270_v15  ;;  %v291_v22 = vand.u32 2147483648, %v267_v14  ;;  %vm285_vm4 = vweird.f32 %v267_v14 }
  0x3d   : > { %523 = vlog2.f32 %v267_v14  ;;  %v289_v24 = vand.u32 2147483647, %v267_v14  ;;  %vm274_vm6 = vcmp.lt.f32.partialorder %v273_v19, 0.0004427343 }
  0x3e   : > { %v272_v26 = vmul.f32 %v520_v13, %v271_v17  ;;  %v292_v29 = vor.u32 1.1754944e-38, %v291_v22 }
  0x3f   : > { %vm290_vm9 = vcmp.eq.f32.partialorder %v289_v24, 8.507059e+37 }
  0x42   : > { %v522_v16 = vpop.eup %521 }
  0x43   : > { %v524_v18 = vpop.eup %523  ;;  %v281_v20 = vmul.f32 %v522_v16, %v267_v14  ;;  %vm286_vm5 = vweird.f32 %v522_v16 }
  0x44   : > { %v269_v25 = vmul.f32 0.6931472, %v524_v18  ;;  %vm287_vm8 = vmor %vm285_vm4, %vm286_vm5 }
  0x45   : > { %v282_v23 = vsub.f32 1.0, %v281_v20 }
  0x46   : > { %v275_v32 = vsel %vm274_vm6, %v272_v26, %v269_v25 }
  0x47   : > { %v283_v27 = vmul.f32 %v522_v16, %v282_v23  ;;  %v276_v37 = vsub.f32 %v266_v30, %v275_v32 }
  0x49   : > { %v284_v31 = vadd.f32 %v522_v16, %v283_v27  ;;  %v295_v41 = vmul.f32 %v276_v37, %v261_v39 }
  0x4b   : > { %v288_v35 = vsel %vm287_vm8, %v522_v16, %v284_v31 }
  0x4c   : > { %v293_v36 = vsel %vm290_vm9, %v292_v29, %v288_v35 }
  0x4d   : > { %v294_v38 = vmul.f32 %v293_v36, %v278_v33 }
  0x4f   : > { %v296_v40 = vsub.f32 1.0, %v294_v38 }
  0x51   : > { %v297_v42 = vmul.f32 %v296_v40, %v296_v40 }
  0x53   : > { %v298_v43 = vsub.f32 0.0, %v297_v42 }
  0x55   : > { %v299_v44 = vmul.f32 %v298_v43, %v295_v41 }
  0x57   : > { %v302_v45 = vsel %vm301_vm10, %v299_v44, 0.0 }
  0x58   : > { %v303_v46 = vrot.slane %v302_v45, 4 }
  0x5a   : > { %v304_v47 = vadd.f32 %v303_v46, %v302_v45 }
  0x5c   : > { %v305_v48 = vrot.slane %v304_v47, 2 }
  0x5e   : > { %v306_v49 = vadd.f32 %v305_v48, %v304_v47 }
  0x60   : > { %v307_v50 = vrot.slane %v306_v49, 1 }
  0x62   : > { %v308_v52 = vadd.f32 %v307_v50, %v306_v49 }
  0x64   : > { %v309_v53 = vadd.f32 %v308_v52, %v300_v51 }
  0x66   : > { %310 = vst [vmem:[%s792_s15] sm:$0x1] %v309_v53 }
  0x67   : > { %612 = shalt.err (!%p609_p13)
}
  0x68   : > { %453 = dma.vmem_to_hbm [thread:$0]  (%p742_p9), %s324_s20, 16, %s326_s26, %s312_s19  }
  0x69 PF: > { %s337_s3 = sand.u32 1, %s651_s9   ;;  %p463_p0 = pnand %p434_p12, %p749_p11 }
  0x6a   : > { %s338_s7 = scalar_lea.sflag [#allocation4], %s337_s3 }
  0x6b   : > { %p464_p1 = pneg %p463_p0 }
  0x6d   : > { %646 = dma.done.wait (%p464_p1), %s338_s7, 16  }
  0x6e   : > { %648 = vsyncadd (%p464_p1), %s338_s7, 4294967280  ;;  %s21_s14 = sadd.s32 1, %s671_s14   ;;  %s852_s9 = smov %s655_s10 }
  0x6f   : > { %p18_p2 = scmp.ge.s32.totalorder %s21_s14, 4   ;;  %s853_s10 = smov %s659_s11 }
  0x70   : > { %s854_s11 = smov %s747_s23  ;;  %s855_s12 = smov %s667_s13 }
  0x71   : > { %s856_s13 = smov %s858_s17  ;;  %20 = sbr.rel (!%p18_p2) target bundleno = 8 (0x8), region = 93 }
  0x76   :  { %343 = vsyncpa [#allocation3], 1 }
  0x77   :  { %345 = vsyncpa [#allocation3 + $0x1], 1 }
  0x78   :  { %346 = vsyncpa [#allocation6], 1 }
  0x79   :  { %348 = vsyncpa [#allocation6 + $0x1], 1 }
  0x7a   :  { %349 = vsyncpa [#allocation4], 1 }
  0x7b   :  { %351 = vsyncpa [#allocation4 + $0x1], 1 }

</bundles_post_ra>
